<compile_context>
chip_gen: v5e
topology: v5e:2x2
jax: 0.10.0
libtpu: 0.0.40
codegen_flags: <defaults>
</compile_context>

<pallas_src>
import numpy as np
import jax
import jax.numpy as jnp
from jax.experimental import pallas as pl
from jax.experimental.pallas import tpu as pltpu


# ----------------------------------------------------------------------------
# Config (small synthetic sizes).  Real module uses SAM input size 1024.
# ----------------------------------------------------------------------------
SAM_SIZE = 128      # TODO(synk): real EfficientSamWrapper3d uses 1024x1024 SAM input
PATCH = 16
EMBED = 32
NUM_MASKS = 3


# ----------------------------------------------------------------------------
# Host-side helpers
# ----------------------------------------------------------------------------
def _resize_matrix(out_size, in_size):
    """Bilinear (PyTorch align_corners=False) resize as a dense (out, in) matrix."""
    scale = in_size / out_size
    i = np.arange(out_size)
    src = (i + 0.5) * scale - 0.5
    src = np.clip(src, 0.0, in_size - 1)
    x0 = np.clip(np.floor(src).astype(np.int64), 0, in_size - 1)
    x1 = np.minimum(x0 + 1, in_size - 1)
    lam = (src - x0).astype(np.float32)
    W = np.zeros((out_size, in_size), dtype=np.float32)
    W[i, x0] += 1.0 - lam
    W[i, x1] += lam
    return W


def _vmem_capacity_bytes():
    try:
        return int(pltpu.get_tpu_info().vmem_capacity_bytes)
    except Exception:
        return 64 * 1024 * 1024     # conservative fallback (v7x per-core VMEM)


def _compiler_params(n_parallel=1):
    # Explicit vmem limit: v5e default scoped VMEM is only 16 MiB; keep headroom
    # below physical capacity (64 MiB on v7x, 128 MiB on v5e/v6e).
    return pltpu.CompilerParams(
        dimension_semantics=("parallel",) * n_parallel,
        vmem_limit_bytes=_vmem_capacity_bytes() // 2)


def _pick_block(n, bytes_per_row, budget_bytes, align=1, prefer_multi_step=True):
    """Largest divisor t of n with t*bytes_per_row <= budget and
    (t % align == 0 or t == n).  Prefer a proper divisor so the grid keeps
    >= 2 steps (feeds v7x's second TensorCore); harmless on v5e/v6e."""
    limit = max(1, budget_bytes // max(int(bytes_per_row), 1))
    cands = [t for t in range(1, n + 1)
             if n % t == 0 and (t % align == 0 or t == n) and t <= limit]
    if not cands:
        return n
    t = max(cands)
    if prefer_multi_step and t == n and n > 1:
        proper = [c for c in cands if c < n]
        if proper:
            t = max(proper)
    return t


# ----------------------------------------------------------------------------
# Pallas kernel: batched separable resize   out[s] = A @ x[s] @ Bt
# (image->SAM upsample and the composed logit resize)
# ----------------------------------------------------------------------------
def batched_matmul_resize(x, A, Bt, out_dtype=jnp.float32,
                          compute_dtype=jnp.bfloat16):
    n, hin, win = x.shape
    out_h, out_w = A.shape[0], Bt.shape[1]

    csize = np.dtype(compute_dtype).itemsize
    osize = np.dtype(out_dtype).itemsize
    bytes_per_slab = (2 * hin * win * csize          # double-buffered input
                      + hin * out_w * 4              # f32 W-pass intermediate
                      + 2 * out_h * out_w * osize)   # double-buffered output
    tn = _pick_block(n, bytes_per_slab, _vmem_capacity_bytes() // 4)

    A_c = jnp.asarray(A, compute_dtype)      # (out_h, hin)
    Bt_c = jnp.asarray(Bt, compute_dtype)    # (win, out_w)
    x_c = x.astype(compute_dtype)

    def kernel(a_ref, bt_ref, x_ref, o_ref):
        a = a_ref[...]
        bt = bt_ref[...]
        # W-pass: one wide matmul over all tn slabs (f32 accumulation on MXU).
        xv = x_ref[...].reshape(tn * hin, win)
        t = jnp.dot(xv, bt, preferred_element_type=jnp.float32)      # (tn*hin, out_w)
        t = t.astype(compute_dtype)
        # H-pass per slab (static, sublane-aligned slices of the VMEM-resident t).
        # TODO(synk): a single wide H-pass needs a lane<->sublane relayout of t in
        # VMEM; kept per-slab to stay within well-supported Mosaic ops.
        for s in range(tn):
            ts = t[s * hin:(s + 1) * hin, :]
            o_ref[s] = jnp.dot(a, ts,
                               preferred_element_type=jnp.float32).astype(o_ref.dtype)

    return pl.pallas_call(
        kernel,
        out_shape=jax.ShapeDtypeStruct((n, out_h, out_w), out_dtype),
        grid=(n // tn,),
        in_specs=[
            pl.BlockSpec((out_h, hin), lambda i: (0, 0)),      # A resident
            pl.BlockSpec((win, out_w), lambda i: (0, 0)),      # Bt resident
            pl.BlockSpec((tn, hin, win), lambda i: (i, 0, 0)),
        ],
        out_specs=pl.BlockSpec((tn, out_h, out_w), lambda i: (i, 0, 0)),
        compiler_params=_compiler_params(),
    )(A_c, Bt_c, x_c)


# ----------------------------------------------------------------------------
# Pallas kernel: fused 3x3/stride1/pad1 max-pool + first-nonzero point index
# ----------------------------------------------------------------------------
def maxpool_first_point_index(label_bool):
    """label_bool: (N, H, W) {0,1} float.  Returns (N,) int32: the row-major
    flat index of the first nonzero pixel of maxpool3x3(label) (0 if empty).
    The pooled volume never reaches HBM: the first nonzero of the 3x3 dilation
    of a nonneg mask equals min over nonzero (r, c) of flat(max(r-1,0), max(c-1,0))."""
    n, hh, ww = label_bool.shape
    tn = _pick_block(n, hh * ww * 4 * 2, _vmem_capacity_bytes() // 8, align=8)
    big = hh * ww

    def kernel(x_ref, o_ref):
        v = x_ref[...]                                               # (tn, H, W)
        row = jax.lax.broadcasted_iota(jnp.int32, (tn, hh, ww), 1)
        col = jax.lax.broadcasted_iota(jnp.int32, (tn, hh, ww), 2)
        cand = jnp.where(v > 0,
                         jnp.maximum(row - 1, 0) * ww + jnp.maximum(col - 1, 0),
                         big)
        m = jnp.min(cand, axis=2)                                    # (tn, H)
        m = jnp.min(m, axis=1, keepdims=True)                        # (tn, 1)
        o_ref[...] = jnp.where(m >= big, 0, m)

    idx = pl.pallas_call(
        kernel,
        out_shape=jax.ShapeDtypeStruct((n, 1), jnp.int32),
        grid=(n // tn,),
        in_specs=[pl.BlockSpec((tn, hh, ww), lambda i: (i, 0, 0))],
        out_specs=pl.BlockSpec((tn, 1), lambda i: (i, 0)),
        compiler_params=_compiler_params(),
    )(label_bool.astype(jnp.float32))
    return idx[:, 0]


# ----------------------------------------------------------------------------
# Pallas kernel: patch-embedding matmul over ALL batch elements at once
# (channel repeat + *255 already folded into the weight by the wrapper)
# ----------------------------------------------------------------------------
def patch_embed_all(patches, w_effT, bias):
    """patches: (K, Ntot) with Ntot = bs*Np; w_effT: (E, K); bias: (E,).
    Returns (E, Ntot) float32 = tanh(w_effT @ patches + bias)."""
    k, ntot = patches.shape
    e = w_effT.shape[0]
    bn = _pick_block(ntot, (k * 2 + e * 4) * 2, _vmem_capacity_bytes() // 4,
                     align=128)

    def kernel(w_ref, b_ref, x_ref, o_ref):
        acc = jnp.dot(w_ref[...], x_ref[...], preferred_element_type=jnp.float32)
        o_ref[...] = jnp.tanh(acc + b_ref[...])                      # f32 epilogue (EUP)

    return pl.pallas_call(
        kernel,
        out_shape=jax.ShapeDtypeStruct((e, ntot), jnp.float32),
        grid=(ntot // bn,),
        in_specs=[
            pl.BlockSpec((e, k), lambda i: (0, 0)),                  # weights resident
            pl.BlockSpec((e, 1), lambda i: (0, 0)),
            pl.BlockSpec((k, bn), lambda i: (0, i)),
        ],
        out_specs=pl.BlockSpec((e, bn), lambda i: (0, i)),
        compiler_params=_compiler_params(),
    )(w_effT.astype(jnp.bfloat16), bias.reshape(e, 1).astype(jnp.float32),
      patches.astype(jnp.bfloat16))


# ----------------------------------------------------------------------------
# Pallas kernel: sigmoid + threshold + per-slice gating, lane-dense rows
# ----------------------------------------------------------------------------
def sigmoid_threshold_gate(logit_flat, gate):
    """logit_flat: (N, HW) pre-sigmoid; gate: (N, 1) in {0,1}.
       Returns (mask*gate [bf16, exact 0/1], sigmoid(logit)*gate [f32])."""
    n, hw = logit_flat.shape
    bytes_per_row = hw * (4 + 4 + 2) * 2 + 16
    tr = _pick_block(n, bytes_per_row, _vmem_capacity_bytes() // 4, align=8)

    def kernel(x_ref, g_ref, m_ref, l_ref):
        sg = jax.nn.sigmoid(x_ref[...])                 # f32 (v5e has no bf16 VPU/EUP)
        g = g_ref[...]                                  # (tr, 1)
        l_ref[...] = sg * g
        m_ref[...] = jnp.where(sg > 0.5, g, 0.0).astype(m_ref.dtype)

    return pl.pallas_call(
        kernel,
        out_shape=(jax.ShapeDtypeStruct((n, hw), jnp.bfloat16),
                   jax.ShapeDtypeStruct((n, hw), jnp.float32)),
        grid=(n // tr,),
        in_specs=[pl.BlockSpec((tr, hw), lambda i: (i, 0)),
                  pl.BlockSpec((tr, 1), lambda i: (i, 0))],
        out_specs=[pl.BlockSpec((tr, hw), lambda i: (i, 0)),
                   pl.BlockSpec((tr, hw), lambda i: (i, 0))],
        compiler_params=_compiler_params(),
    )(logit_flat.astype(jnp.float32), gate.astype(jnp.float32))


# ----------------------------------------------------------------------------
# Wrapper (mirrors EfficientSamWrapper3d._forward3d / forward_sam_3d)
# ----------------------------------------------------------------------------
class DataItem:
    def __init__(self, image, segment, dataset):
        self.image = image
        self.segment = segment
        self.dataset = dataset


class DatasetTag:
    def __init__(self, value):
        self.value = value


class SeparetionMaskResult:
    def __init__(self, result_logit, result_mask):
        self.result_logit = result_logit
        self.result_mask = result_mask


class EfficientSamWrapper3dPallas:
    def __init__(self):
        # Deterministic synthetic EfficientSam parameters.
        key = jax.random.PRNGKey(42)
        k1, k2, k3, k4 = jax.random.split(key, 4)
        kdim = 3 * PATCH * PATCH
        self.w_patch = 0.001 * jax.random.normal(k1, (kdim, EMBED), jnp.float32)
        self.b_patch = jnp.zeros((EMBED,), jnp.float32)
        self.w_query = jax.random.normal(k2, (2, EMBED), jnp.float32)
        self.b_query = jnp.zeros((EMBED,), jnp.float32)
        self.mask_tokens = jax.random.normal(k3, (NUM_MASKS, EMBED), jnp.float32)
        self.w_iou = 0.1 * jax.random.normal(k4, (NUM_MASKS, EMBED), jnp.float32)
        self.b_iou = jnp.zeros((NUM_MASKS,), jnp.float32)
        # label-id lists (synthetic stand-ins for config-driven label lists)
        self.train_target_label_id_list = [[1, 2]]
        self.eval_target_label_id_list = [[1, 2, 3]]
        # Fold the 3x channel repeat and the *255 of scale_image_to_sam_input_3d
        # into an effective single-channel weight:
        #   tanh(repeat3(255*x) @ W + b) == tanh(x @ (255 * sum_c W_c) + b)
        w_eff = 255.0 * self.w_patch.reshape(3, PATCH * PATCH, EMBED).sum(0)  # (K, E)
        self.w_effT = w_eff.T                                                 # (E, K)

    # --- synthetic EfficientSam.get_image_embeddings ------------------------
    def get_image_embeddings(self, image_m):
        """image_m: (bs, 4h, 4w) single-channel montage -> (E, bs, Np)."""
        bs, mh, mw = image_m.shape
        rh = _resize_matrix(SAM_SIZE, mh)            # (S, 4h)
        rwt = _resize_matrix(SAM_SIZE, mw).T         # (4w, S)
        scaled = batched_matmul_resize(image_m, rh, rwt,
                                       out_dtype=jnp.bfloat16,
                                       compute_dtype=jnp.bfloat16)   # (bs, S, S)
        hp = SAM_SIZE // PATCH
        # patchify (pure layout op, XLA): (bs, S, S) -> (K, bs*Np) so the patch
        # embed is ONE wide matmul over every batch element.
        # TODO(synk): fusing this rearrangement into the resize kernel needs a
        # lane<->sublane relayout in VMEM; kept in XLA for lowering safety.
        patches = scaled.reshape(bs, hp, PATCH, hp, PATCH)
        patches = patches.transpose(2, 4, 0, 1, 3).reshape(PATCH * PATCH,
                                                           bs * hp * hp)
        emb = patch_embed_all(patches, self.w_effT, self.b_patch)    # (E, bs*Np)
        return emb.reshape(EMBED, bs, hp * hp)                       # (E, bs, Np)

    # --- synthetic EfficientSam.predict_masks (kept at decoder resolution) ---
    def predict_masks_lowres(self, image_embeddings, batched_points, input_w):
        n = batched_points.shape[0]
        bs = image_embeddings.shape[1]
        hp = SAM_SIZE // PATCH
        pts = batched_points.reshape(n, 2) / float(input_w)
        q = jnp.tanh(pts @ self.w_query + self.b_query)              # (n, E)
        qm = q[:, None, :] + self.mask_tokens[None]                  # (n, M, E)
        # point_labels are all ones in this wrapper; they do not alter the query.
        iou = jax.nn.sigmoid(jnp.einsum("nme,me->nm", qm, self.w_iou) + self.b_iou)
        # mask-decoder matmul is tiny -> plain einsum; rows are (label_id, batch)
        nk = n // bs
        low = jnp.einsum("kbme,ebp->kbmp",
                         qm.reshape(nk, bs, NUM_MASKS, EMBED), image_embeddings)
        low = low.reshape(n, NUM_MASKS, hp, hp)
        return low, iou

    # --- get_point_prompt -----------------------------------------------------
    def get_point_prompt(self, label_bool, scale):
        """label_bool: (N, H, W) {0,1} float (N = n_labels*bs, batched)."""
        n, hh, ww = label_bool.shape
        # TODO(synk): torch picks a *random* nonzero via random.randint; here we
        # deterministically pick the first nonzero (index 0 -> coords (0,0) when
        # empty, matching the torch zeros(2) fallback).
        idx = maxpool_first_point_index(label_bool)                  # (N,)
        row = (idx // ww).astype(jnp.float32)
        col = (idx % ww).astype(jnp.float32)
        coords = jnp.stack([col, row], axis=-1) * scale              # (N, 2)
        point_coords = coords[:, None, None, :]                      # (N,1,1,2)
        point_labels = jnp.ones((n, 1, 1), dtype=jnp.int32)
        return point_coords, point_labels

    # --- forward_sam_3d (batched over all target label ids) -------------------
    def forward_sam_3d(self, image_m, label_bool, image_embeddings, label_size):
        """image_m: (bs, 4h, 4w); label_bool: (N, 4h, 4w) with N = n_labels*bs.
        Returns pre-sigmoid montage logits (N, 4h, 4w) for the top-iou mask."""
        label_h, label_w = label_size
        scale = SAM_SIZE / image_m.shape[-1]   # TODO(synk): reference uses 1024 / w
        point_coords, _point_labels = self.get_point_prompt(label_bool, scale)
        low, iou = self.predict_masks_lowres(image_embeddings, point_coords, SAM_SIZE)
        sorted_ids = jnp.argsort(-iou, axis=-1)
        iou_sorted = jnp.take_along_axis(iou, sorted_ids, axis=-1)
        # only the top-iou mask is used downstream -> select BEFORE resizing
        best = sorted_ids[:, 0]
        low_sel = jnp.take_along_axis(low, best[:, None, None, None], axis=1)[:, 0]
        # Composed resize: (hp -> SAM bilinear upsample) o (SAM -> label_size
        # bilinear downsample) composed into one weight matrix per side, so the
        # SAM-resolution logit never exists in HBM.  bf16 inputs, f32 accumulation.
        hp = SAM_SIZE // PATCH
        rh = _resize_matrix(label_h, SAM_SIZE) @ _resize_matrix(SAM_SIZE, hp)   # (4h, hp)
        rw = _resize_matrix(label_w, SAM_SIZE) @ _resize_matrix(SAM_SIZE, hp)   # (4w, hp)
        logit_m = batched_matmul_resize(low_sel, rh, rw.T,
                                        out_dtype=jnp.float32,
                                        compute_dtype=jnp.bfloat16)  # (N, 4h, 4w)
        # sigmoid / threshold / gating are applied lane-dense in _forward3d;
        # they commute with the pure reshape/permute done there.
        return logit_m, iou_sorted

    # --- _forward3d -----------------------------------------------------------
    def _forward3d(self, data_item, eval=False, all_label=False):
        image, label, db = data_item.image, data_item.segment, data_item.dataset
        bs, d, h, w = label.shape
        assert d == 16
        result_logit = [None] * 5
        result_mask = [None] * 5

        image_m = image.reshape(bs, 4, 4, h, w).transpose(0, 1, 3, 2, 4)
        image_m = image_m.reshape(bs, 4 * h, 4 * w)                   # (bs, 4h, 4w)
        label5 = label.reshape(bs, 4, 4, h, w)
        # per-slice "any label present" gate (reference computes it from the FULL
        # label volume, not per target id) -- trivial, plain jnp.
        label_only = (label5.reshape(bs * 16, h * w).sum(axis=-1) > 0)
        label_only = label_only.astype(jnp.float32).reshape(bs * 16, 1)
        label_m = label5.transpose(0, 1, 3, 2, 4).reshape(bs, 4 * h, 4 * w)

        index = 0 if all_label else db.value
        target_label_ids = (self.eval_target_label_id_list[index] if eval
                            else self.train_target_label_id_list[index])
        nk = len(target_label_ids)

        # image encoder (scale_image_to_sam_input_3d folded in)
        image_embeddings = self.get_image_embeddings(image_m)          # (E, bs, Np)

        # batch every target label id through one SAM pass: one point kernel,
        # one resize, one gate call for the whole forward.
        ids = jnp.asarray(target_label_ids, label_m.dtype)
        label_bool = (label_m[None] == ids[:, None, None, None])       # (nk, bs, 4h, 4w)
        label_bool = label_bool.reshape(nk * bs, 4 * h, 4 * w).astype(jnp.float32)

        logit_m, _iou = self.forward_sam_3d(image_m, label_bool, image_embeddings,
                                            (4 * h, 4 * w))            # (nk*bs, 4h, 4w)

        # montage -> per-slice rows, flattened lane-dense (rows = nk*bs*16, lanes = h*w)
        logit_slices = logit_m.reshape(nk * bs, 4, h, 4, w).transpose(0, 1, 3, 2, 4)
        logit_slices = logit_slices.reshape(nk * bs * 16, h * w)
        gate = jnp.tile(label_only.reshape(1, bs * 16, 1), (nk, 1, 1))
        gate = gate.reshape(nk * bs * 16, 1)

        masks_g, logit_g = sigmoid_threshold_gate(logit_slices, gate)
        masks_g = masks_g.reshape(nk, bs, 16, h, w)
        logit_g = logit_g.reshape(nk, bs, 16, h, w)
        for i, k in enumerate(target_label_ids):
            result_logit[k] = logit_g[i]
            result_mask[k] = masks_g[i]
        return SeparetionMaskResult(result_logit, result_mask)

    def forward(self, data_item):
        return self._forward3d(data_item)


# ----------------------------------------------------------------------------
if __name__ == "__main__":
    bs, d, h, w = 2, 16, 16, 16
    key = jax.random.PRNGKey(0)
    k_img, k_lab = jax.random.split(key)
    image = jax.random.uniform(k_img, (bs, d, h, w), jnp.float32)
    label = jax.random.randint(k_lab, (bs, d, h, w), 0, 5, dtype=jnp.int32)

    wrapper = EfficientSamWrapper3dPallas()
    result = wrapper.forward(DataItem(image, label, DatasetTag(0)))

    for k in range(5):
        if result.result_logit[k] is not None:
            jax.block_until_ready(result.result_logit[k])
            jax.block_until_ready(result.result_mask[k])
            assert result.result_logit[k].shape == (bs, 16, h, w)
            assert result.result_mask[k].shape == (bs, 16, h, w)
    print("KERNEL_OK")
</pallas_src>

<mosaic_0001>
module attributes {stable_mosaic.version = 11 : i64} {
  func.func @kernel(%arg0: i32, %arg1: memref<128x64xbf16, #tpu.memory_space<vmem>>, %arg2: memref<64x128xbf16, #tpu.memory_space<vmem>>, %arg3: memref<1x64x64xbf16, #tpu.memory_space<vmem>>, %arg4: memref<1x128x128xbf16, #tpu.memory_space<vmem>>) attributes {dimension_semantics = [#tpu.dimension_semantics<parallel>], iteration_bounds = array<i64: 2>, scalar_prefetch = 0 : i64, scratch_operands = 0 : i64, tpu.core_type = #tpu.core_type<tc>, window_params = [{pipeline_mode = #tpu.pipeline_mode<synchronous>, transform_indices = @transform_0, window_bounds = array<i64: 128, 64>}, {pipeline_mode = #tpu.pipeline_mode<synchronous>, transform_indices = @transform_1, window_bounds = array<i64: 64, 128>}, {transform_indices = @transform_2, window_bounds = array<i64: 1, 64, 64>}, {transform_indices = @transform_3, window_bounds = array<i64: 1, 128, 128>}]} {
    %c0 = arith.constant 0 : index
    %c0_0 = arith.constant 0 : index
    %0 = vector.load %arg1[%c0, %c0_0] : memref<128x64xbf16, #tpu.memory_space<vmem>>, vector<128x64xbf16>
    %c0_1 = arith.constant 0 : index
    %c0_2 = arith.constant 0 : index
    %1 = vector.load %arg2[%c0_1, %c0_2] : memref<64x128xbf16, #tpu.memory_space<vmem>>, vector<64x128xbf16>
    %c0_3 = arith.constant 0 : index
    %c0_4 = arith.constant 0 : index
    %c0_5 = arith.constant 0 : index
    %2 = vector.load %arg3[%c0_3, %c0_4, %c0_5] : memref<1x64x64xbf16, #tpu.memory_space<vmem>>, vector<1x64x64xbf16>
    %3 = vector.shape_cast %2 : vector<1x64x64xbf16> to vector<64x64xbf16>
    %cst = arith.constant dense<0.000000e+00> : vector<64x128xf32>
    %4 = tpu.matmul %3, %1, %cst {dimension_numbers = #tpu.dot_dimension_numbers<[1], [0], [0], [1], [0, 0, 1, 1], [], []>} : vector<64x64xbf16>, vector<64x128xbf16>, vector<64x128xf32> -> vector<64x128xf32>
    %5 = arith.truncf %4 : vector<64x128xf32> to vector<64x128xbf16>
    %cst_6 = arith.constant dense<0.000000e+00> : vector<128x128xf32>
    %6 = tpu.matmul %0, %5, %cst_6 {dimension_numbers = #tpu.dot_dimension_numbers<[1], [0], [0], [1], [0, 0, 1, 1], [], []>} : vector<128x64xbf16>, vector<64x128xbf16>, vector<128x128xf32> -> vector<128x128xf32>
    %7 = arith.truncf %6 : vector<128x128xf32> to vector<128x128xbf16>
    %c0_7 = arith.constant 0 : index
    %c0_8 = arith.constant 0 : index
    %c0_9 = arith.constant 0 : index
    %8 = vector.load %arg4[%c0_7, %c0_8, %c0_9] : memref<1x128x128xbf16, #tpu.memory_space<vmem>>, vector<1x128x128xbf16>
    %9 = vector.shape_cast %8 : vector<1x128x128xbf16> to vector<128x128xbf16>
    %10 = vector.shape_cast %7 : vector<128x128xbf16> to vector<1x128x128xbf16>
    tpu.vector_store %arg4[%c0_7, %c0_8, %c0_9], %10 {strides = array<i32>} : memref<1x128x128xbf16, #tpu.memory_space<vmem>>, vector<1x128x128xbf16>,
    return
  }
  func.func @transform_0(%arg0: i32) -> (i32, i32) {
    %c0_i32 = arith.constant 0 : i32
    %c0_i32_0 = arith.constant 0 : i32
    %c0_i32_1 = arith.constant 0 : i32
    return %c0_i32, %c0_i32_0 : i32, i32
  }
  func.func @transform_1(%arg0: i32) -> (i32, i32) {
    %c0_i32 = arith.constant 0 : i32
    %c0_i32_0 = arith.constant 0 : i32
    %c0_i32_1 = arith.constant 0 : i32
    return %c0_i32, %c0_i32_0 : i32, i32
  }
  func.func @transform_2(%arg0: i32) -> (i32, i32, i32) {
    %c0_i32 = arith.constant 0 : i32
    %c0_i32_0 = arith.constant 0 : i32
    %c0_i32_1 = arith.constant 0 : i32
    return %arg0, %c0_i32, %c0_i32_0 : i32, i32, i32
  }
  func.func @transform_3(%arg0: i32) -> (i32, i32, i32) {
    %c0_i32 = arith.constant 0 : i32
    %c0_i32_0 = arith.constant 0 : i32
    %c0_i32_1 = arith.constant 0 : i32
    return %arg0, %c0_i32, %c0_i32_0 : i32, i32, i32
  }
}

</mosaic_0001>

<bundles_post_ra>
// kernel: tpu_custom_call.1
= control target key start
LH: loop header
LB: loop body
LE: loop exit
PB: predicated region body
PF: predicated region fallthrough
CT: control target
= control target key end

     0   :  { %8 = vsyncpa [#allocation3], 0  ;;  %s955_s0 = inlined_call_operand.vmem [shape: bf16[128,64], index: 0, kind: input, shape index: {}]   ;;  %s956_s1 = inlined_call_operand.vmem [shape: bf16[64,128], index: 1, kind: input, shape index: {}]   ;;  %s957_s2 = inlined_call_operand.vmem [shape: bf16[2,64,64], index: 2, kind: input, shape index: {}]   ;;  %s958_s3 = inlined_call_operand.hbm [shape: bf16[2,128,128], index: 3, kind: output, shape index: {}]  }
   0x1   :  { %10 = vsyncpa [#allocation3 + $0x1], 0  ;;  %s807_s12 = smov 0   ;;  %s809_s13 = smov 0  }
   0x2   :  { %s811_s14 = smov 0   ;;  %s813_s15 = smov 0  }
   0x3 LB: > { %s828_s16 = sadd.s32 4294967295, %s783_s15   ;;  %s515_s17 = sadd.s32 4294967294, %s783_s15   ;;  %s783_s15 = sphi %s813_s15, %s964_s15   ;;  %s779_s14 = sphi %s811_s14, %s963_s14   ;;  %s775_s13 = sphi %s809_s13, %s962_s13   ;;  %s771_s12 = sphi %s807_s12, %s961_s12  }
   0x4   : > { %s832_s18 = sadd.s32 1, %s783_s15   ;;  %s91_s19 = sadd.s32 1, %s779_s14 }
   0x5   : > { %s88_s20 = ssub.s32 %s783_s15, %s832_s18  ;;  %p101_p0 = scmp.ne.s32.totalorder %s779_s14, %s775_s13 }
   0x6   : > { %p89_p1 = scmp.eq.s32.totalorder %s88_s20, 0  ;;  %p102_p2 = scmp.eq.s32.totalorder %s828_s16, 1 }
   0x7   : > { %p107_p3 = scmp.ne.s32.totalorder %s775_s13, %s771_s12  ;;  %p108_p4 = scmp.eq.s32.totalorder %s515_s17, 1 }
   0x8   : > { %s843_s21 = scalar_select %p89_p1, %s779_s14, %s91_s19  }
   0x9   : > { %p845_p5 = por %p102_p2, %p101_p0  ;;  %p849_p6 = por %p108_p4, %p107_p3 }
   0xa   : > { %p518_p7 = scmp.ge.s32.totalorder %s783_s15, 1  ;;  %p140_p8 = scmp.lt.s32.totalorder %s783_s15, 3 }
   0xc   : > { %p141_p9 = pnand %p518_p7, %p140_p8 }
   0xd   : > { %p164_p10 = scmp.lt.s32.totalorder (!%p141_p9), %s828_s16, 1  ;;  %s161_s8 = sand.u32 (!%p141_p9), 1, %s775_s13  }
   0xe   : > { %144 = sbr.rel (%p141_p9) target bundleno = 392 (0x188), region = 32  ;;  %s620_s11 = sshll.u32 (!%p141_p9), %s828_s16, 6 }
   0xf   : > { %s449_s20 = scalar_lea.hbm (!%p141_p9), %s958_s3, %s620_s11  ;;  %s438_s26 = scalar_lea.sflag (!%p141_p9), [#allocation3], %s161_s8 }
  0x10   : > { %s452_s25 = sshll.u32 (!%p141_p9), %s449_s20, 4  ;;  %s741_s30 = scalar_lea.hbm (!%p141_p9), %s958_s3, 128  ;;  %s453_s25 = int_to_ptr.hbm [resolvable:$true] %s452_s25 }
  0x11   : > { %s735_s27 = sshra.s32 (!%p141_p9), %s453_s25, 4  ;;  %s736_s27 = int_to_ptr.hbm [resolvable:$true] %s735_s27 }
  0x12   : > { %p742_p0 = scmp.lt.s32.totalorder (!%p141_p9), %s736_s27, %s958_s3 }
  0x13   : > { %v615_v0 = vld [vmem:[%s956_s1 + $0x18] sm:$0xff]  ;;  %v614_v1 = vld [vmem:[%s956_s1 + $0x10] sm:$0xff]  ;;  %s165_s28 = scalar_select %p164_p10, %s828_s16, 1  ;;  %v613_v2 = vld [vmem:[%s956_s1 + $0x8] sm:$0xff]  ;;  %vm246_vm0 = vcmask 523264  }
  0x14   : > { %263 = vmatpush.bf16.msra.mxu0 %v615_v0  ;;  %668 = vmatpush.bf16.msra.mxu3 %v615_v0  ;;  %v612_v3 = vld [vmem:[%s956_s1] sm:$0xff]  ;;  %v607_v21 = vld [vmem:[%s955_s0 + $0x18] sm:$0xff]  ;;  %v610_v22 = vld [vmem:[%s955_s0 + $0x30] sm:$0xff]  ;;  %s737_s16 = scalar_lea.hbm %s736_s27, 64 }
  0x15   : > { %s603_s4 = sshll.u32 %s165_s28, 5  ;;  %v604_v20 = vld [vmem:[%s955_s0] sm:$0xff]  ;;  %v605_v23 = vld [vmem:[%s955_s0 + $0x8] sm:$0xff]  ;;  %v611_v25 = vld [vmem:[%s955_s0 + $0x38] sm:$0xff]  ;;  %p738_p11 = scmp.ne.s32.totalorder %s736_s27, %s737_s16 }
  0x16   : > { %s168_s9 = scalar_lea.vmem %s957_s2, %s603_s4  ;;  %v608_v24 = vld [vmem:[%s955_s0 + $0x20] sm:$0xff]  ;;  %v606_v26 = vld [vmem:[%s955_s0 + $0x10] sm:$0xff]  ;;  %v609_v27 = vld [vmem:[%s955_s0 + $0x28] sm:$0xff]  ;;  %p743_p1 = scmp.lt.s32.totalorder %s741_s30, %s737_s16 }
  0x17   : > { %v616_v4 = vld [vmem:[%s168_s9] sm:$0xff]  ;;  %v619_v5 = vld [vmem:[%s168_s9 + $0x18] sm:$0xff]  ;;  %v617_v6 = vld [vmem:[%s168_s9 + $0x8] sm:$0xff]  ;;  %p739_p12 = pnand %p738_p11, %p845_p5 }
  0x18   : > { %264 = vmatpush.bf16.msra.mxu0 %v614_v1  ;;  %669 = vmatpush.bf16.msra.mxu3 %v614_v1  ;;  %v618_v7 = vld [vmem:[%s168_s9 + $0x10] sm:$0xff]  ;;  %s519_s9 = sshll.u32 %s161_s8, 6  ;;  %p744_p2 = por %p743_p1, %p742_p0 }
  0x19   : > { %s911_s10 = scalar_lea.vmem [#allocation2], %s519_s9  ;;  %p740_p13 = pneg %p739_p12 }
  0x1a   : > { %s450_s24 = sshll.u32 %s911_s10, 4  ;;  %s451_s24 = int_to_ptr.vmem [resolvable:$true] %s450_s24 }
  0x1b   : > { %p745_p3 = pnand %p744_p2, %p740_p13 }
  0x1c   : > { %265 = vmatpush.bf16.msra.mxu0 %v613_v2  ;;  %670 = vmatpush.bf16.msra.mxu3 %v613_v2 }
  0x20   : > { %266 = vmatpush.bf16.msra.mxu0 %v612_v3  ;;  %671 = vmatpush.bf16.msra.mxu3 %v612_v3 }
  0x23   : > { %554 = vmatmul.msk.bf16.vlgmr.msra.gmra.mxu0 %vm246_vm0, %v616_v4  ;;  %557 = vmatmul.msk.bf16.vlgmr.msra.gmra.mxu3 %vm246_vm0, %v619_v5 }
  0x33   : > { %555 = vmatmul.msk.bf16.gmra.mxu0 %vm246_vm0, %v617_v6 }
  0x43   : > { %556 = vmatmul.msk.bf16.gmra.mxu0 %vm246_vm0, %v618_v7 }
  0xa0   : > { %v268_v8 = vpop.f32.mrf.mxu0 }
  0xa6   : > { %v283_v9 = vpop.f32.mrf.mxu3 }
  0xa8   : > { %v270_v10 = vpop.f32.mrf.mxu0 }
  0xa9   : > { %v288_v19 = vpack.c.bf16 %v270_v10, %v268_v8 }
  0xae   : > { %v285_v11 = vpop.f32.mrf.mxu3 }
  0xaf   : > { %v291_v12 = vpack.c.bf16 %v285_v11, %v283_v9 }
  0xb0   : > { %v273_v13 = vpop.f32.mrf.mxu0 }
  0xb1   : > { %360 = vmatpush.bf16.msra.mxu1 %v291_v12  ;;  %672 = vmatpush.bf16.msra.mxu2 %v291_v12 }
  0xb2   : > { %673 = vmatpush.bf16.msrb.mxu3 %v291_v12 }
  0xb8   : > { %v275_v14 = vpop.f32.mrf.mxu0 }
  0xb9   : > { %v289_v18 = vpack.c.bf16 %v275_v14, %v273_v13 }
  0xc0   : > { %v278_v15 = vpop.f32.mrf.mxu0 }
  0xc8   : > { %v280_v16 = vpop.f32.mrf.mxu0 }
  0xc9   : > { %v290_v17 = vpack.c.bf16 %v280_v16, %v278_v15 }
  0xcb   : > { %361 = vmatpush.bf16.msra.mxu1 %v290_v17  ;;  %674 = vmatpush.bf16.msra.mxu2 %v290_v17 }
  0xcc   : > { %675 = vmatpush.bf16.msrb.mxu3 %v290_v17 }
  0xcf   : > { %362 = vmatpush.bf16.msra.mxu1 %v289_v18  ;;  %676 = vmatpush.bf16.msra.mxu2 %v289_v18 }
  0xd0   : > { %677 = vmatpush.bf16.msrb.mxu3 %v289_v18 }
  0xd3   : > { %363 = vmatpush.bf16.msra.mxu1 %v288_v19  ;;  %678 = vmatpush.bf16.msra.mxu2 %v288_v19 }
  0xd4   : > { %679 = vmatpush.bf16.msrb.mxu3 %v288_v19 }
  0xd6   : > { %590 = vmatmul.msk.bf16.vlgmr.msra.gmra.mxu1 %vm246_vm0, %v604_v20  ;;  %593 = vmatmul.msk.bf16.vlgmr.msra.gmra.mxu2 %vm246_vm0, %v607_v21 }
  0xd7   : > { %596 = vmatmul.msk.bf16.vlgmr.msrb.gmra.mxu3 %vm246_vm0, %v610_v22 }
  0xe6   : > { %591 = vmatmul.msk.bf16.gmra.mxu1 %vm246_vm0, %v605_v23  ;;  %594 = vmatmul.msk.bf16.gmra.mxu2 %vm246_vm0, %v608_v24 }
  0xe7   : > { %597 = vmatmul.msk.bf16.gmra.mxu3 %vm246_vm0, %v611_v25 }
  0xf6   : > { %592 = vmatmul.msk.bf16.gmra.mxu1 %vm246_vm0, %v606_v26  ;;  %595 = vmatmul.msk.bf16.gmra.mxu2 %vm246_vm0, %v609_v27 }
 0x153   : > { %v365_v28 = vpop.f32.mrf.mxu1 }
 0x159   : > { %v380_v29 = vpop.f32.mrf.mxu2 }
 0x15a   : > { %v395_v30 = vpop.f32.mrf.mxu3 }
 0x15b   : > { %v367_v31 = vpop.f32.mrf.mxu1 }
 0x15c   : > { %v624_v32 = vpack.c.bf16 %v367_v31, %v365_v28 }
 0x15e   : > { %625 = vst [vmem:[%s911_s10] sm:$0xff] %v624_v32  }
 0x161   : > { %v382_v33 = vpop.f32.mrf.mxu2 }
 0x162   : > { %v639_v34 = vpack.c.bf16 %v382_v33, %v380_v29  ;;  %v397_v35 = vpop.f32.mrf.mxu3 }
 0x163   : > { %v370_v36 = vpop.f32.mrf.mxu1  ;;  %v654_v37 = vpack.c.bf16 %v397_v35, %v395_v30 }
 0x164   : > { %663 = vst [vmem:[%s911_s10 + $0x18] sm:$0xff] %v639_v34  }
 0x165   : > { %666 = vst [vmem:[%s911_s10 + $0x30] sm:$0xff] %v654_v37  }
 0x169   : > { %v385_v38 = vpop.f32.mrf.mxu2 }
 0x16a   : > { %v400_v39 = vpop.f32.mrf.mxu3 }
 0x16b   : > { %v372_v40 = vpop.f32.mrf.mxu1 }
 0x16c   : > { %v629_v41 = vpack.c.bf16 %v372_v40, %v370_v36 }
 0x16e   : > { %661 = vst [vmem:[%s911_s10 + $0x8] sm:$0xff] %v629_v41  }
 0x171   : > { %v387_v42 = vpop.f32.mrf.mxu2 }
 0x172   : > { %v644_v43 = vpack.c.bf16 %v387_v42, %v385_v38  ;;  %v402_v44 = vpop.f32.mrf.mxu3 }
 0x173   : > { %v375_v45 = vpop.f32.mrf.mxu1  ;;  %v659_v46 = vpack.c.bf16 %v402_v44, %v400_v39 }
 0x174   : > { %664 = vst [vmem:[%s911_s10 + $0x20] sm:$0xff] %v644_v43  }
 0x175   : > { %667 = vst [vmem:[%s911_s10 + $0x38] sm:$0xff] %v659_v46  }
 0x179   : > { %v390_v47 = vpop.f32.mrf.mxu2 }
 0x17b   : > { %v377_v48 = vpop.f32.mrf.mxu1 }
 0x17c   : > { %v634_v49 = vpack.c.bf16 %v377_v48, %v375_v45 }
 0x17e   : > { %662 = vst [vmem:[%s911_s10 + $0x10] sm:$0xff] %v634_v49  }
 0x181   : > { %v392_v50 = vpop.f32.mrf.mxu2 }
 0x182   : > { %v649_v51 = vpack.c.bf16 %v392_v50, %v390_v47 }
 0x184   : > { %665 = vst [vmem:[%s911_s10 + $0x28] sm:$0xff] %v649_v51  }
 0x185   : > { %748 = shalt.err (!%p745_p3)
}
 0x186   : > { %s785_s6 = smov 64   ;;  %s786_s7 = smov 4  }
 0x187   : > { %680 = dma.vmem_to_hbm [thread:$0]  (%p845_p5), %s451_s24, 1024, %s453_s25, %s438_s26, %s785_s6, %s785_s6, %s786_s7  }
 0x188 PF: > { %p686_p4 = scmp.ge.s32.totalorder %s783_s15, 2  ;;  %s467_s8 = sand.u32 1, %s771_s12  }
 0x189   : > { %s468_s9 = scalar_lea.sflag [#allocation3], %s467_s8 }
 0x18a   : > { %p683_p7 = pnand %p686_p4, %p849_p6 }
 0x18c   : > { %p684_p8 = pneg %p683_p7 }
 0x18e   : > { %766 = dma.done.wait (%p684_p8), %s468_s9, 1024  }
 0x18f   : > { %768 = vsyncadd (%p684_p8), %s468_s9, 4294966272  ;;  %p13_p9 = scmp.ge.s32.totalorder %s832_s18, 4   ;;  %s961_s12 = smov %s775_s13 }
 0x190   : > { %s962_s13 = smov %s779_s14  ;;  %s963_s14 = smov %s843_s21 }
 0x191   : > { %s964_s15 = smov %s832_s18  ;;  %15 = sbr.rel (!%p13_p9) target bundleno = 3 (0x3), region = 67 }
 0x196   :  { %474 = vsyncpa [#allocation3], 1 }
 0x197   :  { %476 = vsyncpa [#allocation3 + $0x1], 1 }

</bundles_post_ra>
